<compile_context>
chip_gen: v5e
topology: v5e:2x2
jax: 0.10.0
libtpu: 0.0.40
codegen_flags: <defaults>
</compile_context>

<pallas_src>
import functools
import math

import jax
import jax.numpy as jnp
from jax.experimental import pallas as pl
from jax.experimental.pallas import tpu as pltpu


LANE = 128

PARAM_ORDER = ('wx1', 'bx1', 'wx2', 'bx2',
               'wm1', 'bm1', 'wm2', 'bm2',
               'ws1', 'bs1', 'ws2', 'bs2',
               'wo1', 'bo1', 'wo2', 'bo2')


def _round_up(n, m):
    return (n + m - 1) // m * m


def psld_kernel(x_ref,
                wx1_ref, bx1_ref, wx2_ref, bx2_ref,
                wm1_ref, bm1_ref, wm2_ref, bm2_ref,
                ws1_ref, bs1_ref, ws2_ref, bs2_ref,
                wo1_ref, bo1_ref, wo2_ref, bo2_ref,
                out_ref, *, seq_len):
    f32 = jnp.float32
    x = x_ref[...].astype(f32)                       # (TM, Lp); lanes >= seq_len are 0
    tm, lp = x.shape

    # ---- decompose: mean / biased var of the centered series (torch semantics) ----
    inv_l = jnp.float32(1.0 / seq_len)
    means = jnp.sum(x, axis=-1, keepdims=True) * inv_l            # (TM, 1)
    lane_ids = jax.lax.broadcasted_iota(jnp.int32, (tm, lp), 1)
    valid = lane_ids < seq_len
    xc = jnp.where(valid, x - means, 0.0)                         # zero the padded lanes
    var = jnp.sum(xc * xc, axis=-1, keepdims=True) * inv_l
    stdev = jnp.sqrt(var + 1e-7)                                  # (TM, 1)
    xn = xc * (1.0 / stdev)                                       # (TM, Lp)

    mm_dtype = wx1_ref.dtype                                      # bf16 (or f32)

    # ---- x branch (MXU, f32 accumulation) ----
    x1 = jnp.dot(xn.astype(mm_dtype), wx1_ref[...],
                 preferred_element_type=f32) + bx1_ref[...]
    x1 = jnp.maximum(x1, 0.0)                                     # (TM, OCp)
    x2 = jnp.dot(x1.astype(mm_dtype), wx2_ref[...],
                 preferred_element_type=f32) + bx2_ref[...]       # (TM, Pp)

    # ---- mean / stdev branches (input feature dim 1 -> VPU broadcast, f32) ----
    m1 = jnp.maximum(means * wm1_ref[...] + bm1_ref[...], 0.0)    # (TM, OC4p)
    m2 = jnp.sum(m1 * wm2_ref[...], axis=-1, keepdims=True) + bm2_ref[...]   # (TM, 1)
    s1 = jnp.maximum(stdev * ws1_ref[...] + bs1_ref[...], 0.0)    # (TM, OC4p)
    s2 = jnp.sum(s1 * ws2_ref[...], axis=-1, keepdims=True) + bs2_ref[...]   # (TM, 1)

    # ---- output head ----
    out = x2 * s2                                                 # (TM, Pp)
    o1 = jnp.dot(out.astype(mm_dtype), wo1_ref[...],
                 preferred_element_type=f32) + bo1_ref[...]
    o1 = jnp.maximum(o1, 0.0)                                     # (TM, OCp)
    o2 = jnp.dot(o1.astype(mm_dtype), wo2_ref[...],
                 preferred_element_type=f32) + bo2_ref[...] + m2  # (TM, Pp)
    out_ref[...] = o2.astype(out_ref.dtype)


def _pad2(a, rows, cols, dtype):
    a = a.astype(dtype)
    r, c = a.shape
    if (r, c) == (rows, cols):
        return a
    return jnp.pad(a, ((0, rows - r), (0, cols - c)))


@functools.partial(jax.jit, static_argnames=("tm", "matmul_dtype"))
def psld_forward(x, params, tm=128, matmul_dtype=jnp.bfloat16):
    """x: (B, C, seq_len) float32 -> (B, C, pred_len) float32."""
    B, C, L = x.shape
    OC = params['wx1'].shape[1]
    OC4 = params['wm1'].shape[1]
    P = params['wx2'].shape[1]

    Lp = _round_up(L, LANE)
    OCp = _round_up(OC, LANE)
    OC4p = _round_up(OC4, LANE)
    Pp = _round_up(P, LANE)

    M = B * C
    # Full 128-row MXU tiles for large inputs, minimal (8-aligned) tile for
    # tiny ones so we do not pad the row axis 16x.
    tm_eff = max(8, min(tm, _round_up(M, 8)))
    Mp = _round_up(M, tm_eff)

    # Flatten rows and zero-pad rows + feature lanes (lane-dense tiles).
    x2d = jnp.pad(x.reshape(M, L), ((0, Mp - M), (0, Lp - L)))

    f32 = jnp.float32
    padded = {
        # big matmul weights go to the MXU in matmul_dtype; biases stay f32
        'wx1': _pad2(params['wx1'], Lp, OCp, matmul_dtype),
        'bx1': _pad2(params['bx1'], 1, OCp, f32),
        'wx2': _pad2(params['wx2'], OCp, Pp, matmul_dtype),
        'bx2': _pad2(params['bx2'], 1, Pp, f32),
        'wm1': _pad2(params['wm1'], 1, OC4p, f32),
        'bm1': _pad2(params['bm1'], 1, OC4p, f32),
        'wm2': _pad2(params['wm2'], 1, OC4p, f32),
        'bm2': params['bm2'].astype(f32),                  # (1, 1)
        'ws1': _pad2(params['ws1'], 1, OC4p, f32),
        'bs1': _pad2(params['bs1'], 1, OC4p, f32),
        'ws2': _pad2(params['ws2'], 1, OC4p, f32),
        'bs2': params['bs2'].astype(f32),                  # (1, 1)
        'wo1': _pad2(params['wo1'], Pp, OCp, matmul_dtype),
        'bo1': _pad2(params['bo1'], 1, OCp, f32),
        'wo2': _pad2(params['wo2'], OCp, Pp, matmul_dtype),
        'bo2': _pad2(params['bo2'], 1, Pp, f32),
    }
    weight_args = [padded[name] for name in PARAM_ORDER]

    def invariant_spec(arr):
        ndim = arr.ndim
        return pl.BlockSpec(arr.shape, lambda i, _n=ndim: (0,) * _n)

    in_specs = [pl.BlockSpec((tm_eff, Lp), lambda i: (i, 0))]
    in_specs += [invariant_spec(a) for a in weight_args]

    # Explicit VMEM budget: double-buffered row tiles + resident weights +
    # intermediates, clamped to the smallest physical VMEM (64 MiB on v7x).
    def nbytes(a):
        return a.size * a.dtype.itemsize
    weight_bytes = sum(nbytes(a) for a in weight_args)
    tile_bytes = 4 * tm_eff * (Lp + Pp)
    interm_bytes = 4 * tm_eff * (Lp + 2 * OCp + 2 * Pp + 2 * OC4p)
    vmem_bytes = 2 * tile_bytes + 2 * weight_bytes + interm_bytes + (4 << 20)
    vmem_bytes = int(min(max(vmem_bytes, 16 << 20), 64 << 20))

    out2d = pl.pallas_call(
        functools.partial(psld_kernel, seq_len=L),
        out_shape=jax.ShapeDtypeStruct((Mp, Pp), x.dtype),
        grid=(Mp // tm_eff,),
        in_specs=in_specs,
        out_specs=pl.BlockSpec((tm_eff, Pp), lambda i: (i, 0)),
        compiler_params=pltpu.CompilerParams(
            dimension_semantics=("parallel",),
            vmem_limit_bytes=vmem_bytes),
    )(x2d, *weight_args)

    return out2d[:M, :P].reshape(B, C, P)


def init_params(key, seq_len, d_model, pred_len):
    """Deterministic PyTorch-style Linear init (uniform +-1/sqrt(fan_in))."""
    oc = d_model * 2
    oc4 = oc // 4

    def linear(key, fan_in, fan_out):
        kw, kb = jax.random.split(key)
        bound = 1.0 / math.sqrt(fan_in)
        w = jax.random.uniform(kw, (fan_in, fan_out), jnp.float32, -bound, bound)
        b = jax.random.uniform(kb, (1, fan_out), jnp.float32, -bound, bound)
        return w, b

    keys = jax.random.split(key, 8)
    p = {}
    p['wx1'], p['bx1'] = linear(keys[0], seq_len, oc)     # (L, OC), (1, OC)
    p['wm1'], p['bm1'] = linear(keys[1], 1, oc4)          # (1, OC4), (1, OC4)
    p['ws1'], p['bs1'] = linear(keys[2], 1, oc4)
    p['wx2'], p['bx2'] = linear(keys[3], oc, pred_len)    # (OC, P), (1, P)
    p['wm2'], p['bm2'] = linear(keys[4], oc4, 1)
    p['ws2'], p['bs2'] = linear(keys[5], oc4, 1)
    p['wo1'], p['bo1'] = linear(keys[6], pred_len, oc)    # (P, OC), (1, OC)
    p['wo2'], p['bo2'] = linear(keys[7], oc, pred_len)    # (OC, P), (1, P)
    # l_m2 / l_s2 weights are used as row vectors (1, OC4) inside the kernel
    p['wm2'] = p['wm2'].reshape(1, oc4)
    p['ws2'] = p['ws2'].reshape(1, oc4)
    return p


def psld_reference(x, params):
    """Pure-JAX f32 reference mirroring the PyTorch forward."""
    means = jnp.mean(x, axis=-1, keepdims=True)
    xc = x - means
    var = jnp.mean(xc * xc, axis=-1, keepdims=True)     # unbiased=False
    stdev = jnp.sqrt(var + 1e-7)
    xn = xc / stdev

    x1 = jax.nn.relu(xn @ params['wx1'] + params['bx1'])
    x2 = x1 @ params['wx2'] + params['bx2']
    m1 = jax.nn.relu(means * params['wm1'] + params['bm1'])
    m2 = jnp.sum(m1 * params['wm2'], axis=-1, keepdims=True) + params['bm2']
    s1 = jax.nn.relu(stdev * params['ws1'] + params['bs1'])
    s2 = jnp.sum(s1 * params['ws2'], axis=-1, keepdims=True) + params['bs2']
    out = x2 * s2
    o1 = jax.nn.relu(out @ params['wo1'] + params['bo1'])
    return o1 @ params['wo2'] + params['bo2'] + m2


if __name__ == "__main__":
    B, C = 2, 4            # batch, variables
    seq_len = 16
    d_model = 32           # out_channels = 64, out_channels // 4 = 16
    pred_len = 8

    key = jax.random.PRNGKey(0)
    kx, kp = jax.random.split(key)
    x = jax.random.normal(kx, (B, C, seq_len), dtype=jnp.float32)
    params = init_params(kp, seq_len, d_model, pred_len)

    ref = psld_reference(x, params)
    ref_scale = jnp.maximum(jnp.max(jnp.abs(ref)), 1.0)

    # f32 matmul path: exact check against the torch-faithful reference.
    out_f32 = jax.block_until_ready(
        psld_forward(x, params, matmul_dtype=jnp.float32))
    assert out_f32.shape == (B, C, pred_len)
    assert jnp.max(jnp.abs(out_f32 - ref)) <= 1e-4 * ref_scale, "f32 kernel mismatch"

    # bf16 matmul path (production setting for v6e/v7x MXU), f32 accumulation.
    out_bf16 = jax.block_until_ready(
        psld_forward(x, params, matmul_dtype=jnp.bfloat16))
    assert out_bf16.shape == (B, C, pred_len)
    assert jnp.max(jnp.abs(out_bf16 - ref)) <= 5e-2 * ref_scale, "bf16 kernel mismatch"

    print("KERNEL_OK")
</pallas_src>

<mosaic_0001>
module attributes {stable_mosaic.version = 11 : i64} {
  func.func @psld_kernel(%arg0: i32, %arg1: memref<8x128xf32, #tpu.memory_space<vmem>>, %arg2: memref<128x128xf32, #tpu.memory_space<vmem>>, %arg3: memref<1x128xf32, #tpu.memory_space<vmem>>, %arg4: memref<128x128xf32, #tpu.memory_space<vmem>>, %arg5: memref<1x128xf32, #tpu.memory_space<vmem>>, %arg6: memref<1x128xf32, #tpu.memory_space<vmem>>, %arg7: memref<1x128xf32, #tpu.memory_space<vmem>>, %arg8: memref<1x128xf32, #tpu.memory_space<vmem>>, %arg9: memref<1x1xf32, #tpu.memory_space<vmem>>, %arg10: memref<1x128xf32, #tpu.memory_space<vmem>>, %arg11: memref<1x128xf32, #tpu.memory_space<vmem>>, %arg12: memref<1x128xf32, #tpu.memory_space<vmem>>, %arg13: memref<1x1xf32, #tpu.memory_space<vmem>>, %arg14: memref<128x128xf32, #tpu.memory_space<vmem>>, %arg15: memref<1x128xf32, #tpu.memory_space<vmem>>, %arg16: memref<128x128xf32, #tpu.memory_space<vmem>>, %arg17: memref<1x128xf32, #tpu.memory_space<vmem>>, %arg18: memref<8x128xf32, #tpu.memory_space<vmem>>) attributes {dimension_semantics = [#tpu.dimension_semantics<parallel>], iteration_bounds = array<i64: 1>, scalar_prefetch = 0 : i64, scratch_operands = 0 : i64, tpu.core_type = #tpu.core_type<tc>, window_params = [{transform_indices = @transform_0, window_bounds = array<i64: 8, 128>}, {pipeline_mode = #tpu.pipeline_mode<synchronous>, transform_indices = @transform_1, window_bounds = array<i64: 128, 128>}, {pipeline_mode = #tpu.pipeline_mode<synchronous>, transform_indices = @transform_2, window_bounds = array<i64: 1, 128>}, {pipeline_mode = #tpu.pipeline_mode<synchronous>, transform_indices = @transform_3, window_bounds = array<i64: 128, 128>}, {pipeline_mode = #tpu.pipeline_mode<synchronous>, transform_indices = @transform_4, window_bounds = array<i64: 1, 128>}, {pipeline_mode = #tpu.pipeline_mode<synchronous>, transform_indices = @transform_5, window_bounds = array<i64: 1, 128>}, {pipeline_mode = #tpu.pipeline_mode<synchronous>, transform_indices = @transform_6, window_bounds = array<i64: 1, 128>}, {pipeline_mode = #tpu.pipeline_mode<synchronous>, transform_indices = @transform_7, window_bounds = array<i64: 1, 128>}, {pipeline_mode = #tpu.pipeline_mode<synchronous>, transform_indices = @transform_8, window_bounds = array<i64: 1, 1>}, {pipeline_mode = #tpu.pipeline_mode<synchronous>, transform_indices = @transform_9, window_bounds = array<i64: 1, 128>}, {pipeline_mode = #tpu.pipeline_mode<synchronous>, transform_indices = @transform_10, window_bounds = array<i64: 1, 128>}, {pipeline_mode = #tpu.pipeline_mode<synchronous>, transform_indices = @transform_11, window_bounds = array<i64: 1, 128>}, {pipeline_mode = #tpu.pipeline_mode<synchronous>, transform_indices = @transform_12, window_bounds = array<i64: 1, 1>}, {pipeline_mode = #tpu.pipeline_mode<synchronous>, transform_indices = @transform_13, window_bounds = array<i64: 128, 128>}, {pipeline_mode = #tpu.pipeline_mode<synchronous>, transform_indices = @transform_14, window_bounds = array<i64: 1, 128>}, {pipeline_mode = #tpu.pipeline_mode<synchronous>, transform_indices = @transform_15, window_bounds = array<i64: 128, 128>}, {pipeline_mode = #tpu.pipeline_mode<synchronous>, transform_indices = @transform_16, window_bounds = array<i64: 1, 128>}, {transform_indices = @transform_17, window_bounds = array<i64: 8, 128>}]} {
    %c0 = arith.constant 0 : index
    %c0_0 = arith.constant 0 : index
    %0 = vector.load %arg1[%c0, %c0_0] : memref<8x128xf32, #tpu.memory_space<vmem>>, vector<8x128xf32>
    %cst = arith.constant dense<0.000000e+00> : vector<8xf32>
    %1 = vector.multi_reduction <add>, %0, %cst [1] : vector<8x128xf32> to vector<8xf32>
    %2 = vector.shape_cast %1 : vector<8xf32> to vector<8x1xf32>
    %cst_1 = arith.constant 6.250000e-02 : f32
    %3 = vector.broadcast %cst_1 : f32 to vector<8x1xf32>
    %4 = arith.mulf %2, %3 : vector<8x1xf32>
    %5 = tpu.iota {dimensions = array<i32: 1>} : vector<8x128xi32>
    %c16_i32 = arith.constant 16 : i32
    %6 = vector.broadcast %c16_i32 : i32 to vector<8x128xi32>
    %7 = arith.cmpi slt, %5, %6 : vector<8x128xi32>
    %8 = vector.broadcast %4 : vector<8x1xf32> to vector<8x128xf32>
    %9 = arith.subf %0, %8 : vector<8x128xf32>
    %cst_2 = arith.constant 0.000000e+00 : f32
    %10 = vector.broadcast %cst_2 : f32 to vector<8x128xf32>
    %11 = arith.select %7, %9, %10 : vector<8x128xi1>, vector<8x128xf32>
    %12 = arith.mulf %11, %11 : vector<8x128xf32>
    %cst_3 = arith.constant dense<0.000000e+00> : vector<8xf32>
    %13 = vector.multi_reduction <add>, %12, %cst_3 [1] : vector<8x128xf32> to vector<8xf32>
    %14 = vector.shape_cast %13 : vector<8xf32> to vector<8x1xf32>
    %cst_4 = arith.constant 6.250000e-02 : f32
    %15 = vector.broadcast %cst_4 : f32 to vector<8x1xf32>
    %16 = arith.mulf %14, %15 : vector<8x1xf32>
    %cst_5 = arith.constant 1.000000e-07 : f32
    %17 = vector.broadcast %cst_5 : f32 to vector<8x1xf32>
    %18 = arith.addf %16, %17 : vector<8x1xf32>
    %19 = math.sqrt %18 : vector<8x1xf32>
    %cst_6 = arith.constant 1.000000e+00 : f32
    %20 = vector.broadcast %cst_6 : f32 to vector<8x1xf32>
    %21 = arith.divf %20, %19 : vector<8x1xf32>
    %22 = vector.broadcast %21 : vector<8x1xf32> to vector<8x128xf32>
    %23 = arith.mulf %11, %22 : vector<8x128xf32>
    %c0_7 = arith.constant 0 : index
    %c0_8 = arith.constant 0 : index
    %24 = vector.load %arg2[%c0_7, %c0_8] : memref<128x128xf32, #tpu.memory_space<vmem>>, vector<128x128xf32>
    %cst_9 = arith.constant dense<0.000000e+00> : vector<8x128xf32>
    %25 = tpu.matmul %23, %24, %cst_9 {dimension_numbers = #tpu.dot_dimension_numbers<[1], [0], [0], [1], [0, 0, 1, 1], [], []>} : vector<8x128xf32>, vector<128x128xf32>, vector<8x128xf32> -> vector<8x128xf32>
    %c0_10 = arith.constant 0 : index
    %c0_11 = arith.constant 0 : index
    %26 = vector.load %arg3[%c0_10, %c0_11] : memref<1x128xf32, #tpu.memory_space<vmem>>, vector<1x128xf32>
    %27 = vector.broadcast %26 : vector<1x128xf32> to vector<8x128xf32>
    %28 = arith.addf %25, %27 : vector<8x128xf32>
    %cst_12 = arith.constant 0.000000e+00 : f32
    %29 = vector.broadcast %cst_12 : f32 to vector<8x128xf32>
    %30 = arith.maximumf %28, %29 : vector<8x128xf32>
    %c0_13 = arith.constant 0 : index
    %c0_14 = arith.constant 0 : index
    %31 = vector.load %arg4[%c0_13, %c0_14] : memref<128x128xf32, #tpu.memory_space<vmem>>, vector<128x128xf32>
    %cst_15 = arith.constant dense<0.000000e+00> : vector<8x128xf32>
    %32 = tpu.matmul %30, %31, %cst_15 {dimension_numbers = #tpu.dot_dimension_numbers<[1], [0], [0], [1], [0, 0, 1, 1], [], []>} : vector<8x128xf32>, vector<128x128xf32>, vector<8x128xf32> -> vector<8x128xf32>
    %c0_16 = arith.constant 0 : index
    %c0_17 = arith.constant 0 : index
    %33 = vector.load %arg5[%c0_16, %c0_17] : memref<1x128xf32, #tpu.memory_space<vmem>>, vector<1x128xf32>
    %34 = vector.broadcast %33 : vector<1x128xf32> to vector<8x128xf32>
    %35 = arith.addf %32, %34 : vector<8x128xf32>
    %c0_18 = arith.constant 0 : index
    %c0_19 = arith.constant 0 : index
    %36 = vector.load %arg6[%c0_18, %c0_19] : memref<1x128xf32, #tpu.memory_space<vmem>>, vector<1x128xf32>
    %37 = vector.broadcast %4 : vector<8x1xf32> to vector<8x128xf32>
    %38 = vector.broadcast %36 : vector<1x128xf32> to vector<8x128xf32>
    %39 = arith.mulf %37, %38 : vector<8x128xf32>
    %c0_20 = arith.constant 0 : index
    %c0_21 = arith.constant 0 : index
    %40 = vector.load %arg7[%c0_20, %c0_21] : memref<1x128xf32, #tpu.memory_space<vmem>>, vector<1x128xf32>
    %41 = vector.broadcast %40 : vector<1x128xf32> to vector<8x128xf32>
    %42 = arith.addf %39, %41 : vector<8x128xf32>
    %cst_22 = arith.constant 0.000000e+00 : f32
    %43 = vector.broadcast %cst_22 : f32 to vector<8x128xf32>
    %44 = arith.maximumf %42, %43 : vector<8x128xf32>
    %c0_23 = arith.constant 0 : index
    %c0_24 = arith.constant 0 : index
    %45 = vector.load %arg8[%c0_23, %c0_24] : memref<1x128xf32, #tpu.memory_space<vmem>>, vector<1x128xf32>
    %46 = vector.broadcast %45 : vector<1x128xf32> to vector<8x128xf32>
    %47 = arith.mulf %44, %46 : vector<8x128xf32>
    %cst_25 = arith.constant dense<0.000000e+00> : vector<8xf32>
    %48 = vector.multi_reduction <add>, %47, %cst_25 [1] : vector<8x128xf32> to vector<8xf32>
    %49 = vector.shape_cast %48 : vector<8xf32> to vector<8x1xf32>
    %c0_26 = arith.constant 0 : index
    %c0_27 = arith.constant 0 : index
    %50 = vector.load %arg9[%c0_26, %c0_27] : memref<1x1xf32, #tpu.memory_space<vmem>>, vector<1x1xf32>
    %51 = vector.broadcast %50 : vector<1x1xf32> to vector<8x1xf32>
    %52 = arith.addf %49, %51 : vector<8x1xf32>
    %c0_28 = arith.constant 0 : index
    %c0_29 = arith.constant 0 : index
    %53 = vector.load %arg10[%c0_28, %c0_29] : memref<1x128xf32, #tpu.memory_space<vmem>>, vector<1x128xf32>
    %54 = vector.broadcast %19 : vector<8x1xf32> to vector<8x128xf32>
    %55 = vector.broadcast %53 : vector<1x128xf32> to vector<8x128xf32>
    %56 = arith.mulf %54, %55 : vector<8x128xf32>
    %c0_30 = arith.constant 0 : index
    %c0_31 = arith.constant 0 : index
    %57 = vector.load %arg11[%c0_30, %c0_31] : memref<1x128xf32, #tpu.memory_space<vmem>>, vector<1x128xf32>
    %58 = vector.broadcast %57 : vector<1x128xf32> to vector<8x128xf32>
    %59 = arith.addf %56, %58 : vector<8x128xf32>
    %cst_32 = arith.constant 0.000000e+00 : f32
    %60 = vector.broadcast %cst_32 : f32 to vector<8x128xf32>
    %61 = arith.maximumf %59, %60 : vector<8x128xf32>
    %c0_33 = arith.constant 0 : index
    %c0_34 = arith.constant 0 : index
    %62 = vector.load %arg12[%c0_33, %c0_34] : memref<1x128xf32, #tpu.memory_space<vmem>>, vector<1x128xf32>
    %63 = vector.broadcast %62 : vector<1x128xf32> to vector<8x128xf32>
    %64 = arith.mulf %61, %63 : vector<8x128xf32>
    %cst_35 = arith.constant dense<0.000000e+00> : vector<8xf32>
    %65 = vector.multi_reduction <add>, %64, %cst_35 [1] : vector<8x128xf32> to vector<8xf32>
    %66 = vector.shape_cast %65 : vector<8xf32> to vector<8x1xf32>
    %c0_36 = arith.constant 0 : index
    %c0_37 = arith.constant 0 : index
    %67 = vector.load %arg13[%c0_36, %c0_37] : memref<1x1xf32, #tpu.memory_space<vmem>>, vector<1x1xf32>
    %68 = vector.broadcast %67 : vector<1x1xf32> to vector<8x1xf32>
    %69 = arith.addf %66, %68 : vector<8x1xf32>
    %70 = vector.broadcast %69 : vector<8x1xf32> to vector<8x128xf32>
    %71 = arith.mulf %35, %70 : vector<8x128xf32>
    %c0_38 = arith.constant 0 : index
    %c0_39 = arith.constant 0 : index
    %72 = vector.load %arg14[%c0_38, %c0_39] : memref<128x128xf32, #tpu.memory_space<vmem>>, vector<128x128xf32>
    %cst_40 = arith.constant dense<0.000000e+00> : vector<8x128xf32>
    %73 = tpu.matmul %71, %72, %cst_40 {dimension_numbers = #tpu.dot_dimension_numbers<[1], [0], [0], [1], [0, 0, 1, 1], [], []>} : vector<8x128xf32>, vector<128x128xf32>, vector<8x128xf32> -> vector<8x128xf32>
    %c0_41 = arith.constant 0 : index
    %c0_42 = arith.constant 0 : index
    %74 = vector.load %arg15[%c0_41, %c0_42] : memref<1x128xf32, #tpu.memory_space<vmem>>, vector<1x128xf32>
    %75 = vector.broadcast %74 : vector<1x128xf32> to vector<8x128xf32>
    %76 = arith.addf %73, %75 : vector<8x128xf32>
    %cst_43 = arith.constant 0.000000e+00 : f32
    %77 = vector.broadcast %cst_43 : f32 to vector<8x128xf32>
    %78 = arith.maximumf %76, %77 : vector<8x128xf32>
    %c0_44 = arith.constant 0 : index
    %c0_45 = arith.constant 0 : index
    %79 = vector.load %arg16[%c0_44, %c0_45] : memref<128x128xf32, #tpu.memory_space<vmem>>, vector<128x128xf32>
    %cst_46 = arith.constant dense<0.000000e+00> : vector<8x128xf32>
    %80 = tpu.matmul %78, %79, %cst_46 {dimension_numbers = #tpu.dot_dimension_numbers<[1], [0], [0], [1], [0, 0, 1, 1], [], []>} : vector<8x128xf32>, vector<128x128xf32>, vector<8x128xf32> -> vector<8x128xf32>
    %c0_47 = arith.constant 0 : index
    %c0_48 = arith.constant 0 : index
    %81 = vector.load %arg17[%c0_47, %c0_48] : memref<1x128xf32, #tpu.memory_space<vmem>>, vector<1x128xf32>
    %82 = vector.broadcast %81 : vector<1x128xf32> to vector<8x128xf32>
    %83 = arith.addf %80, %82 : vector<8x128xf32>
    %84 = vector.broadcast %52 : vector<8x1xf32> to vector<8x128xf32>
    %85 = arith.addf %83, %84 : vector<8x128xf32>
    %c0_49 = arith.constant 0 : index
    %c0_50 = arith.constant 0 : index
    %86 = vector.load %arg18[%c0_49, %c0_50] : memref<8x128xf32, #tpu.memory_space<vmem>>, vector<8x128xf32>
    tpu.vector_store %arg18[%c0_49, %c0_50], %85 {strides = array<i32>} : memref<8x128xf32, #tpu.memory_space<vmem>>, vector<8x128xf32>,
    return
  }
  func.func @transform_0(%arg0: i32) -> (i32, i32) {
    %c0_i32 = arith.constant 0 : i32
    %c0_i32_0 = arith.constant 0 : i32
    return %arg0, %c0_i32 : i32, i32
  }
  func.func @transform_1(%arg0: i32) -> (i32, i32) {
    %c0_i32 = arith.constant 0 : i32
    %c0_i32_0 = arith.constant 0 : i32
    %c0_i32_1 = arith.constant 0 : i32
    return %c0_i32, %c0_i32_0 : i32, i32
  }
  func.func @transform_2(%arg0: i32) -> (i32, i32) {
    %c0_i32 = arith.constant 0 : i32
    %c0_i32_0 = arith.constant 0 : i32
    %c0_i32_1 = arith.constant 0 : i32
    return %c0_i32, %c0_i32_0 : i32, i32
  }
  func.func @transform_3(%arg0: i32) -> (i32, i32) {
    %c0_i32 = arith.constant 0 : i32
    %c0_i32_0 = arith.constant 0 : i32
    %c0_i32_1 = arith.constant 0 : i32
    return %c0_i32, %c0_i32_0 : i32, i32
  }
  func.func @transform_4(%arg0: i32) -> (i32, i32) {
    %c0_i32 = arith.constant 0 : i32
    %c0_i32_0 = arith.constant 0 : i32
    %c0_i32_1 = arith.constant 0 : i32
    return %c0_i32, %c0_i32_0 : i32, i32
  }
  func.func @transform_5(%arg0: i32) -> (i32, i32) {
    %c0_i32 = arith.constant 0 : i32
    %c0_i32_0 = arith.constant 0 : i32
    %c0_i32_1 = arith.constant 0 : i32
    return %c0_i32, %c0_i32_0 : i32, i32
  }
  func.func @transform_6(%arg0: i32) -> (i32, i32) {
    %c0_i32 = arith.constant 0 : i32
    %c0_i32_0 = arith.constant 0 : i32
    %c0_i32_1 = arith.constant 0 : i32
    return %c0_i32, %c0_i32_0 : i32, i32
  }
  func.func @transform_7(%arg0: i32) -> (i32, i32) {
    %c0_i32 = arith.constant 0 : i32
    %c0_i32_0 = arith.constant 0 : i32
    %c0_i32_1 = arith.constant 0 : i32
    return %c0_i32, %c0_i32_0 : i32, i32
  }
  func.func @transform_8(%arg0: i32) -> (i32, i32) {
    %c0_i32 = arith.constant 0 : i32
    %c0_i32_0 = arith.constant 0 : i32
    %c0_i32_1 = arith.constant 0 : i32
    return %c0_i32, %c0_i32_0 : i32, i32
  }
  func.func @transform_9(%arg0: i32) -> (i32, i32) {
    %c0_i32 = arith.constant 0 : i32
    %c0_i32_0 = arith.constant 0 : i32
    %c0_i32_1 = arith.constant 0 : i32
    return %c0_i32, %c0_i32_0 : i32, i32
  }
  func.func @transform_10(%arg0: i32) -> (i32, i32) {
    %c0_i32 = arith.constant 0 : i32
    %c0_i32_0 = arith.constant 0 : i32
    %c0_i32_1 = arith.constant 0 : i32
    return %c0_i32, %c0_i32_0 : i32, i32
  }
  func.func @transform_11(%arg0: i32) -> (i32, i32) {
    %c0_i32 = arith.constant 0 : i32
    %c0_i32_0 = arith.constant 0 : i32
    %c0_i32_1 = arith.constant 0 : i32
    return %c0_i32, %c0_i32_0 : i32, i32
  }
  func.func @transform_12(%arg0: i32) -> (i32, i32) {
    %c0_i32 = arith.constant 0 : i32
    %c0_i32_0 = arith.constant 0 : i32
    %c0_i32_1 = arith.constant 0 : i32
    return %c0_i32, %c0_i32_0 : i32, i32
  }
  func.func @transform_13(%arg0: i32) -> (i32, i32) {
    %c0_i32 = arith.constant 0 : i32
    %c0_i32_0 = arith.constant 0 : i32
    %c0_i32_1 = arith.constant 0 : i32
    return %c0_i32, %c0_i32_0 : i32, i32
  }
  func.func @transform_14(%arg0: i32) -> (i32, i32) {
    %c0_i32 = arith.constant 0 : i32
    %c0_i32_0 = arith.constant 0 : i32
    %c0_i32_1 = arith.constant 0 : i32
    return %c0_i32, %c0_i32_0 : i32, i32
  }
  func.func @transform_15(%arg0: i32) -> (i32, i32) {
    %c0_i32 = arith.constant 0 : i32
    %c0_i32_0 = arith.constant 0 : i32
    %c0_i32_1 = arith.constant 0 : i32
    return %c0_i32, %c0_i32_0 : i32, i32
  }
  func.func @transform_16(%arg0: i32) -> (i32, i32) {
    %c0_i32 = arith.constant 0 : i32
    %c0_i32_0 = arith.constant 0 : i32
    %c0_i32_1 = arith.constant 0 : i32
    return %c0_i32, %c0_i32_0 : i32, i32
  }
  func.func @transform_17(%arg0: i32) -> (i32, i32) {
    %c0_i32 = arith.constant 0 : i32
    %c0_i32_0 = arith.constant 0 : i32
    return %arg0, %c0_i32 : i32, i32
  }
}

</mosaic_0001>

<bundles_post_ra>
// kernel: psld_forward.1
= control target key start
LH: loop header
LB: loop body
LE: loop exit
PB: predicated region body
PF: predicated region fallthrough
CT: control target
= control target key end

     0   :  { %s718_s0 = inlined_call_operand.vmem [shape: f32[8,128], index: 0, kind: input, shape index: {}]   ;;  %s719_s1 = inlined_call_operand.vmem [shape: f32[128,128], index: 1, kind: input, shape index: {}]   ;;  %s720_s2 = inlined_call_operand.vmem [shape: f32[1,128], index: 2, kind: input, shape index: {}]   ;;  %s721_s3 = inlined_call_operand.vmem [shape: f32[128,128], index: 3, kind: input, shape index: {}]   ;;  %s722_s4 = inlined_call_operand.vmem [shape: f32[1,128], index: 4, kind: input, shape index: {}]   ;;  %s723_s5 = inlined_call_operand.vmem [shape: f32[1,128], index: 5, kind: input, shape index: {}]   ;;  %s724_s6 = inlined_call_operand.vmem [shape: f32[1,128], index: 6, kind: input, shape index: {}]   ;;  %s725_s7 = inlined_call_operand.vmem [shape: f32[1,128], index: 7, kind: input, shape index: {}]   ;;  %s726_s8 = inlined_call_operand.<no memory space> [shape: f32[1,1], index: 8, kind: input, shape index: {}]   ;;  %s727_s9 = inlined_call_operand.vmem [shape: f32[1,128], index: 9, kind: input, shape index: {}]   ;;  %s728_s10 = inlined_call_operand.vmem [shape: f32[1,128], index: 10, kind: input, shape index: {}]   ;;  %s729_s11 = inlined_call_operand.vmem [shape: f32[1,128], index: 11, kind: input, shape index: {}]   ;;  %s730_s13 = inlined_call_operand.vmem [shape: f32[128,128], index: 13, kind: input, shape index: {}]   ;;  %s731_s14 = inlined_call_operand.vmem [shape: f32[1,128], index: 14, kind: input, shape index: {}]   ;;  %s732_s15 = inlined_call_operand.vmem [shape: f32[128,128], index: 15, kind: input, shape index: {}]   ;;  %s733_s16 = inlined_call_operand.vmem [shape: f32[1,128], index: 16, kind: input, shape index: {}]   ;;  %s734_s17 = inlined_call_operand.hbm [shape: f32[8,128], index: 17, kind: output, shape index: {}]   ;;  %s735_s12 = inlined_call_operand.<no memory space> [shape: f32[1,1], index: 12, kind: input, shape index: {}]  }
   0x1   :  { %737 = sst [smem:[#allocation7_spill]] %s718_s0  ;;  %v22_v0 = vstv %s726_s8  ;;  %v24_v1 = vstv %s735_s12 }
   0x2   :  { %738 = sst [smem:[#allocation8_spill]] %s719_s1  ;;  %23 = vst [vmem:[#allocation2] sm:$0x1] %v22_v0 }
   0x3   :  { %25 = vst [vmem:[#allocation3] sm:$0x1] %v24_v1 }
   0x4   :  { %s739_s0 = sld [smem:[#allocation7_spill]] }
   0xa   :  { %v61_v2 = vld [vmem:[%s739_s0] sm:$0xff] }
   0xb   :  { %62 = vadd.xlane.f32.xlu0 %v61_v2 }
   0xc   :  { %26 = vsyncpa [#allocation5], 0  ;;  %v65_v3 = vlaneseq  ;;  %v345_v5 = vld [vmem:[%s723_s5] ss:$0 sm:$0xff]  ;;  %v387_v17 = vmov 0   ;;  %s740_s20 = sld [smem:[#allocation8_spill]] }
   0xd   :  { %v346_v8 = vld [vmem:[%s724_s6] ss:$0 sm:$0xff]  ;;  %343 = vset.pattern.permute.xlu2 %v387_v17  ;;  %342 = vset.pattern.permute.xlu1 %v387_v17  ;;  %s388_s1 = smov [#allocation4]  }
   0xe   :  { %v66_v4 = vand.u32 127, %v65_v3  ;;  %v347_v13 = vld [vmem:[%s725_s7] ss:$0 sm:$0xff]  ;;  %344 = vset.pattern.permute.xlu0 %v387_v17  ;;  %v146_v17 = vld [vmem:[%s721_s3 + $0x10] sm:$0xff]  ;;  %s329_s5 = sshll.u32 %s388_s1, 4  ;;  %s330_s5 = int_to_ptr.vmem [resolvable:$true] %s329_s5 }
   0xf   :  { %v348_v30 = vld [vmem:[#allocation2] ss:$0 sm:$0xff] }
  0x10   :  { %vm67_vm0 = vcmp.lt.s32.totalorder %v66_v4, 16  ;;  %v349_v47 = vld [vmem:[%s727_s9] ss:$0 sm:$0xff]  ;;  %v159_v4 = vld [vmem:[%s721_s3 + $0x78] sm:$0xff] }
  0x11   :  { %v350_v50 = vld [vmem:[%s728_s10] ss:$0 sm:$0xff]  ;;  %164 = vmatpush.msra.mxu1 %v159_v4 }
  0x12   :  { %v118_v18 = vld [vmem:[%s740_s20 + $0x78] sm:$0xff]  ;;  %v117_v19 = vld [vmem:[%s740_s20 + $0x70] sm:$0xff]  ;;  %v116_v20 = vld [vmem:[%s740_s20 + $0x68] sm:$0xff] }
  0x13   :  { %123 = vmatpush.msra.mxu0 %v118_v18  ;;  %v115_v21 = vld [vmem:[%s740_s20 + $0x60] sm:$0xff]  ;;  %v114_v22 = vld [vmem:[%s740_s20 + $0x58] sm:$0xff]  ;;  %v113_v23 = vld [vmem:[%s740_s20 + $0x50] sm:$0xff] }
  0x14   :  { %v112_v24 = vld [vmem:[%s740_s20 + $0x48] sm:$0xff]  ;;  %v111_v25 = vld [vmem:[%s740_s20 + $0x40] sm:$0xff]  ;;  %v110_v26 = vld [vmem:[%s740_s20 + $0x38] sm:$0xff] }
  0x15   :  { %124 = vmatpush.msra.mxu0 %v117_v19  ;;  %v109_v27 = vld [vmem:[%s740_s20 + $0x30] sm:$0xff]  ;;  %v108_v28 = vld [vmem:[%s740_s20 + $0x28] sm:$0xff]  ;;  %v107_v32 = vld [vmem:[%s740_s20 + $0x20] sm:$0xff] }
  0x16   :  { %v106_v33 = vld [vmem:[%s740_s20 + $0x18] sm:$0xff]  ;;  %v105_v37 = vld [vmem:[%s740_s20 + $0x10] sm:$0xff]  ;;  %v104_v38 = vld [vmem:[%s740_s20 + $0x8] sm:$0xff] }
  0x17   :  { %125 = vmatpush.msra.mxu0 %v116_v20  ;;  %v103_v39 = vld [vmem:[%s740_s20] sm:$0xff]  ;;  %v145_v18 = vld [vmem:[%s721_s3 + $0x8] sm:$0xff] }
  0x18   :  { %v351_v54 = vld [vmem:[%s729_s11] ss:$0 sm:$0xff]  ;;  %v352_v20 = vld [vmem:[#allocation3] ss:$0 sm:$0xff] }
  0x19   :  { %126 = vmatpush.msra.mxu0 %v115_v21  ;;  %v144_v19 = vld [vmem:[%s721_s3] sm:$0xff] }
  0x1a   :  { %v356_v4 = vld [vmem:[%s733_s16] ss:$0 sm:$0xff] }
  0x1b   :  { %127 = vmatpush.msra.mxu0 %v114_v22 }
  0x1d   :  { %128 = vmatpush.msra.mxu0 %v113_v23  ;;  %v353_v23 = vld [vmem:[%s720_s2] ss:$0 sm:$0xff] }
  0x1f   :  { %129 = vmatpush.msra.mxu0 %v112_v24 }
  0x21   :  { %130 = vmatpush.msra.mxu0 %v111_v25 }
  0x23   :  { %131 = vmatpush.msra.mxu0 %v110_v26 }
  0x25   :  { %132 = vmatpush.msra.mxu0 %v109_v27  ;;  %v251_v27 = vld [vmem:[%s730_s13 + $0x78] sm:$0xff] }
  0x26   :  { %256 = vmatpush.msra.mxu2 %v251_v27 }
  0x27   :  { %133 = vmatpush.msra.mxu0 %v108_v28  ;;  %v250_v28 = vld [vmem:[%s730_s13 + $0x70] sm:$0xff] }
  0x28   :  { %257 = vmatpush.msra.mxu2 %v250_v28 }
  0x29   :  { %134 = vmatpush.msra.mxu0 %v107_v32  ;;  %v246_v32 = vld [vmem:[%s730_s13 + $0x50] sm:$0xff] }
  0x2b   :  { %135 = vmatpush.msra.mxu0 %v106_v33  ;;  %v245_v33 = vld [vmem:[%s730_s13 + $0x48] sm:$0xff] }
  0x2d   :  { %136 = vmatpush.msra.mxu0 %v105_v37  ;;  %v241_v37 = vld [vmem:[%s730_s13 + $0x28] sm:$0xff] }
  0x2f   :  { %137 = vmatpush.msra.mxu0 %v104_v38  ;;  %v240_v38 = vld [vmem:[%s730_s13 + $0x20] sm:$0xff] }
  0x31   :  { %138 = vmatpush.msra.mxu0 %v103_v39  ;;  %v239_v39 = vld [vmem:[%s730_s13 + $0x18] sm:$0xff] }
  0x7e   :  { %v63_v6 = vpop.xlane.xlu0 %62 }
  0x7f   :  { %v64_v7 = vmul.f32 0.0625, %v63_v6  ;;  %v157_v6 = vld [vmem:[%s721_s3 + $0x68] sm:$0xff] }
  0x81   :  { %v68_v9 = vsub.f32 %v61_v2, %v64_v7  ;;  %v188_v10 = vmul.f32 %v345_v5, %v64_v7  ;;  %v158_v5 = vld [vmem:[%s721_s3 + $0x70] sm:$0xff]  ;;  %v156_v7 = vld [vmem:[%s721_s3 + $0x60] sm:$0xff] }
  0x82   :  { %165 = vmatpush.msra.mxu1 %v158_v5 }
  0x83   :  { %v494_v11 = vsel %vm67_vm0, %v68_v9, 0.0  ;;  %v193_v12 = vadd.f32 %v346_v8, %v188_v10  ;;  %v155_v8 = vld [vmem:[%s721_s3 + $0x58] sm:$0xff]  ;;  %v154_v9 = vld [vmem:[%s721_s3 + $0x50] sm:$0xff]  ;;  %v153_v10 = vld [vmem:[%s721_s3 + $0x48] sm:$0xff] }
  0x84   :  { %v70_v14 = vmul.f32 %v494_v11, %v494_v11  ;;  %166 = vmatpush.msra.mxu1 %v157_v6 }
  0x85   :  { %v194_v15 = vmax.f32 %v193_v12, 0.0  ;;  %v151_v12 = vld [vmem:[%s721_s3 + $0x38] sm:$0xff] }
  0x86   :  { %71 = vadd.xlane.f32.xlu0 %v70_v14  ;;  %167 = vmatpush.msra.mxu1 %v156_v7  ;;  %v149_v14 = vld [vmem:[%s721_s3 + $0x28] sm:$0xff] }
  0x87   :  { %v199_v16 = vmul.f32 %v347_v13, %v194_v15  ;;  %v150_v13 = vld [vmem:[%s721_s3 + $0x30] sm:$0xff]  ;;  %v148_v15 = vld [vmem:[%s721_s3 + $0x20] sm:$0xff] }
  0x88   :  { %168 = vmatpush.msra.mxu1 %v155_v8 }
  0x89   :  { %200 = vadd.xlane.f32.xlu2 %v199_v16  ;;  %v147_v16 = vld [vmem:[%s721_s3 + $0x18] sm:$0xff] }
  0x8a   :  { %169 = vmatpush.msra.mxu1 %v154_v9 }
  0x8c   :  { %170 = vmatpush.msra.mxu1 %v153_v10 }
  0xf9   :  { %v72_v29 = vpop.xlane.xlu0 %71 }
  0xfa   :  { %v73_v31 = vmul.f32 0.0625, %v72_v29  ;;  %v249_v29 = vld [vmem:[%s730_s13 + $0x68] sm:$0xff] }
  0xfb   :  { %258 = vmatpush.msra.mxu2 %v249_v29 }
  0xfc   :  { %v74_v34 = vadd.f32 1e-07, %v73_v31  ;;  %v201_v35 = vpop.xlane.xlu2 %200  ;;  %v247_v31 = vld [vmem:[%s730_s13 + $0x58] sm:$0xff] }
  0xfd   :  { %v206_v36 = vadd.f32 %v348_v30, %v201_v35  ;;  %v248_v30 = vld [vmem:[%s730_s13 + $0x60] sm:$0xff]  ;;  %v243_v35 = vld [vmem:[%s730_s13 + $0x38] sm:$0xff] }
  0xfe   :  { %357 = vrsqrt.f32 %v74_v34  ;;  %vm82_vm1 = vcmp.eq.f32.partialorder %v74_v34, inf  ;;  %v85_v48 = vand.u32 2147483648, %v74_v34  ;;  %vm84_vm2 = vcmp.eq.f32.partialorder %v74_v34, 0.0  ;;  %259 = vmatpush.msra.mxu2 %v248_v30 }
  0xff   :  { %319 = vperm.xlu2 %343, %v206_v36   ;;  %v242_v36 = vld [vmem:[%s730_s13 + $0x30] sm:$0xff] }
 0x100   :  { %260 = vmatpush.msra.mxu2 %v247_v31 }
 0x102   :  { %261 = vmatpush.msra.mxu2 %v246_v32 }
 0x104   :  { %v358_v40 = vpop.eup %357  ;;  %262 = vmatpush.msra.mxu2 %v245_v33 }
 0x105   :  { %v76_v41 = vmul.f32 %v358_v40, %v74_v34 }
 0x107   :  { %v77_v42 = vmul.f32 %v358_v40, %v76_v41  ;;  %v237_v41 = vld [vmem:[%s730_s13 + $0x8] sm:$0xff] }
 0x109   :  { %v78_v43 = vmul.f32 0.5, %v77_v42  ;;  %v236_v42 = vld [vmem:[%s730_s13] sm:$0xff] }
 0x10b   :  { %v79_v44 = vsub.f32 1.5, %v78_v43  ;;  %v292_v43 = vld [vmem:[%s732_s15 + $0x78] sm:$0xff] }
 0x10c   :  { %297 = vmatpush.msra.mxu3 %v292_v43 }
 0x10d   :  { %v80_v45 = vmul.f32 %v358_v40, %v79_v44  ;;  %v238_v40 = vld [vmem:[%s730_s13 + $0x10] sm:$0xff] }
 0x10e   :  { %v291_v44 = vld [vmem:[%s732_s15 + $0x70] sm:$0xff] }
 0x10f   :  { %v81_v46 = vmul.f32 %v80_v45, %v74_v34  ;;  %v290_v45 = vld [vmem:[%s732_s15 + $0x68] sm:$0xff]  ;;  %298 = vmatpush.msra.mxu3 %v291_v44 }
 0x111   :  { %v83_v49 = vsel %vm82_vm1, %v74_v34, %v81_v46  ;;  %v244_v34 = vld [vmem:[%s730_s13 + $0x40] sm:$0xff]  ;;  %299 = vmatpush.msra.mxu3 %v290_v45 }
 0x112   :  { %v86_v51 = vsel %vm84_vm2, %v85_v48, %v83_v49  ;;  %263 = vmatpush.msra.mxu2 %v244_v34  ;;  %v289_v46 = vld [vmem:[%s732_s15 + $0x60] sm:$0xff]  ;;  %v287_v48 = vld [vmem:[%s732_s15 + $0x50] sm:$0xff]  ;;  %v286_v49 = vld [vmem:[%s732_s15 + $0x48] sm:$0xff] }
 0x113   :  { %v211_v52 = vmul.f32 %v349_v47, %v86_v51  ;;  %359 = vrcp.f32 %v86_v51  ;;  %v98_v60 = vand.u32 2147483648, %v86_v51  ;;  %v96_v62 = vand.u32 2147483647, %v86_v51  ;;  %v288_v47 = vld [vmem:[%s732_s15 + $0x58] sm:$0xff]  ;;  %300 = vmatpush.msra.mxu3 %v289_v46 }
 0x114   :  { %vm92_vm4 = vweird.f32 %v86_v51  ;;  %264 = vmatpush.msra.mxu2 %v243_v35 }
 0x115   :  { %v216_v53 = vadd.f32 %v350_v50, %v211_v52  ;;  %v99_v0 = vor.u32 1.1754944e-38, %v98_v60  ;;  %vm97_vm6 = vcmp.eq.f32.partialorder %v96_v62, 8.507059e+37  ;;  %301 = vmatpush.msra.mxu3 %v288_v47  ;;  %v285_v50 = vld [vmem:[%s732_s15 + $0x40] sm:$0xff]  ;;  %v283_v52 = vld [vmem:[%s732_s15 + $0x30] sm:$0xff]  ;;  %v278_v62 = vld [vmem:[%s732_s15 + $0x8] sm:$0xff] }
 0x116   :  { %265 = vmatpush.msra.mxu2 %v242_v36 }
 0x117   :  { %v217_v55 = vmax.f32 %v216_v53, 0.0  ;;  %302 = vmatpush.msra.mxu3 %v287_v48  ;;  %v282_v53 = vld [vmem:[%s732_s15 + $0x28] sm:$0xff] }
 0x118   :  { %266 = vmatpush.msra.mxu2 %v241_v37 }
 0x119   :  { %v360_v56 = vpop.eup %359  ;;  %v222_v57 = vmul.f32 %v351_v54, %v217_v55  ;;  %303 = vmatpush.msra.mxu3 %v286_v49  ;;  %v281_v54 = vld [vmem:[%s732_s15 + $0x20] sm:$0xff]  ;;  %v280_v55 = vld [vmem:[%s732_s15 + $0x18] sm:$0xff] }
 0x11a   :  { %v88_v58 = vmul.f32 %v360_v56, %v86_v51  ;;  %vm93_vm3 = vweird.f32 %v360_v56  ;;  %267 = vmatpush.msra.mxu2 %v240_v38  ;;  %v284_v51 = vld [vmem:[%s732_s15 + $0x38] sm:$0xff] }
 0x11b   :  { %223 = vadd.xlane.f32.xlu1 %v222_v57  ;;  %vm94_vm5 = vmor %vm92_vm4, %vm93_vm3  ;;  %304 = vmatpush.msra.mxu3 %v285_v50 }
 0x11c   :  { %v89_v59 = vsub.f32 1.0, %v88_v58  ;;  %268 = vmatpush.msra.mxu2 %v239_v39 }
 0x11d   :  { %305 = vmatpush.msra.mxu3 %v284_v51 }
 0x11e   :  { %v90_v61 = vmul.f32 %v360_v56, %v89_v59  ;;  %269 = vmatpush.msra.mxu2 %v238_v40 }
 0x11f   :  { %306 = vmatpush.msra.mxu3 %v283_v52 }
 0x120   :  { %v91_v63 = vadd.f32 %v360_v56, %v90_v61  ;;  %270 = vmatpush.msra.mxu2 %v237_v41  ;;  %v279_v61 = vld [vmem:[%s732_s15 + $0x10] sm:$0xff] }
 0x121   :  { %307 = vmatpush.msra.mxu3 %v282_v53 }
 0x122   :  { %v95_v1 = vsel %vm94_vm5, %v360_v56, %v91_v63  ;;  %271 = vmatpush.msra.mxu2 %v236_v42  ;;  %v354_v56 = vld [vmem:[%s722_s4] ss:$0 sm:$0xff] }
 0x123   :  { %v100_v2 = vsel %vm97_vm6, %v99_v0, %v95_v1  ;;  %308 = vmatpush.msra.mxu3 %v281_v54  ;;  %v277_v63 = vld [vmem:[%s732_s15] sm:$0xff]  ;;  %s331_s15 = sshll.u32 %s734_s17, 4  ;;  %s332_s15 = int_to_ptr.hbm [resolvable:$true] %s331_s15 }
 0x124   :  { %v102_v3 = vmul.f32 %v100_v2, %v494_v11  ;;  %v152_v11 = vld [vmem:[%s721_s3 + $0x40] sm:$0xff] }
 0x125   :  { %171 = vmatpush.msra.mxu1 %v152_v11  ;;  %309 = vmatpush.msra.mxu3 %v280_v55  ;;  %v355_v0 = vld [vmem:[%s731_s14] ss:$0 sm:$0xff] }
 0x126   :  { %139 = vmatmul.f32.vlgmr.msra.gmra.mxu0 %v102_v3 }
 0x127   :  { %172 = vmatpush.msra.mxu1 %v151_v12  ;;  %310 = vmatpush.msra.mxu3 %v279_v61 }
 0x129   :  { %173 = vmatpush.msra.mxu1 %v150_v13  ;;  %311 = vmatpush.msra.mxu3 %v278_v62 }
 0x12b   :  { %174 = vmatpush.msra.mxu1 %v149_v14  ;;  %312 = vmatpush.msra.mxu3 %v277_v63 }
 0x12d   :  { %175 = vmatpush.msra.mxu1 %v148_v15 }
 0x12f   :  { %176 = vmatpush.msra.mxu1 %v147_v16 }
 0x131   :  { %177 = vmatpush.msra.mxu1 %v146_v17 }
 0x133   :  { %178 = vmatpush.msra.mxu1 %v145_v18 }
 0x135   :  { %179 = vmatpush.msra.mxu1 %v144_v19 }
 0x159   :  { %v320_v7 = vpop.permute.xlu2 %319 }
 0x18e   :  { %v224_v21 = vpop.xlane.xlu1 %223 }
 0x18f   :  { %v229_v22 = vadd.f32 %v352_v20, %v224_v21 }
 0x191   :  { %232 = vperm.xlu1 %342, %v229_v22  }
 0x1a3   :  { %v140_v24 = vpop.f32.mrf.mxu0 }
 0x1a4   :  { %v141_v25 = vadd.f32 %v353_v23, %v140_v24 }
 0x1a6   :  { %v143_v26 = vmax.f32 %v141_v25, 0.0 }
 0x1a8   :  { %180 = vmatmul.f32.vlgmr.msra.gmra.mxu1 %v143_v26 }
 0x203   :  { %v233_v59 = vpop.permute.xlu1 %232 }
 0x225   :  { %v181_v57 = vpop.f32.mrf.mxu1 }
 0x226   :  { %v182_v58 = vadd.f32 %v354_v56, %v181_v57 }
 0x228   :  { %v235_v60 = vmul.f32 %v233_v59, %v182_v58 }
 0x22a   :  { %272 = vmatmul.f32.vlgmr.msra.gmra.mxu2 %v235_v60 }
 0x2ad   :  { %v273_v1 = vpop.f32.mrf.mxu2 }
 0x2ae   :  { %v274_v2 = vadd.f32 %v355_v0, %v273_v1 }
 0x2b0   :  { %v276_v3 = vmax.f32 %v274_v2, 0.0 }
 0x2b2   :  { %313 = vmatmul.f32.vlgmr.msra.gmra.mxu3 %v276_v3 }
 0x335   :  { %v314_v5 = vpop.f32.mrf.mxu3 }
 0x336   :  { %v315_v6 = vadd.f32 %v356_v4, %v314_v5 }
 0x338   :  { %v322_v8 = vadd.f32 %v320_v7, %v315_v6 }
 0x33a   :  { %323 = vst [vmem:[#allocation4] sm:$0xff] %v322_v8 }
 0x33b   :  { %334 = dma.vmem_to_hbm [thread:$0]  %s330_s5, 128, %s332_s15, [#allocation5]  }
 0x33c   :  { %385 = dma.done.wait [#allocation5], 128  }
 0x33d   :  { %386 = vsyncadd [#allocation5], 4294967168 }
 0x33e   :  { %339 = vsyncpa [#allocation5], 1 }

</bundles_post_ra>
